<compile_context>
chip_gen: v7x
topology: tpu7x:2x2x1
jax: 0.10.0
libtpu: 0.0.40
codegen_flags: <defaults>
</compile_context>

<pallas_src>
import functools

import jax
import jax.numpy as jnp
from jax import lax
from jax.experimental import pallas as pl
from jax.experimental.pallas import tpu as pltpu

VERY_SMALL_NUMBER = 1e-12
LANES = 128


def _round_up(n, m):
    return ((n + m - 1) // m) * m


def fused_anchor_gcn_kernel(x_ref, adj_ref, *rest, num_layers):
    """Whole AnchorGCN forward (all layers) in one kernel invocation.

    Ref order: x (bf16), adj (bf16), w_0 .. w_{L-1} (bf16), out (f32).
    """
    w_refs = rest[:num_layers]
    out_ref = rest[num_layers]

    adj_bf = adj_ref[...]                                 # (N, A) bf16
    adj_f32 = adj_bf.astype(jnp.float32)                  # lossless upcast, used for sums + prescale

    # ---- adjacency normalization: hoisted, computed ONCE, folded into adj ----
    col_sum = jnp.sum(adj_f32, axis=0, keepdims=True)     # (1, A) f32 (sublane reduce)
    row_sum = jnp.sum(adj_f32, axis=1, keepdims=True)     # (N, 1) f32 (lane reduce)
    inv_col = 1.0 / jnp.maximum(col_sum, VERY_SMALL_NUMBER)
    inv_row = 1.0 / jnp.maximum(row_sum, VERY_SMALL_NUMBER)

    # Pre-scaled bf16 MXU operands, reused by every layer:
    #   adj_col_bf^T @ s == node_norm^T @ s ;  adj_row_bf @ t == anchor_norm @ t
    adj_col_bf = (adj_f32 * inv_col).astype(jnp.bfloat16)  # (N, A)
    adj_row_bf = (adj_f32 * inv_row).astype(jnp.bfloat16)  # (N, A)

    h = x_ref[...]                                         # (N, F0_pad) bf16
    for layer in range(num_layers):
        w = w_refs[layer][...]                             # (F_in_pad, F_out_pad) bf16

        # support = h @ W                    (MXU: bf16 operands, f32 accum)
        support = jnp.dot(h, w, preferred_element_type=jnp.float32)        # (N, F_out) f32

        # tmp = node_norm^T @ support        (contract over nodes)
        tmp = lax.dot_general(
            adj_col_bf, support.astype(jnp.bfloat16),
            dimension_numbers=(((0,), (0,)), ((), ())),
            preferred_element_type=jnp.float32,
        )                                                                   # (A, F_out) f32

        # out = anchor_norm @ tmp
        out = jnp.dot(
            adj_row_bf, tmp.astype(jnp.bfloat16),
            preferred_element_type=jnp.float32,
        )                                                                   # (N, F_out) f32

        if layer < num_layers - 1:
            # ReLU in f32 (v5e has no bf16 VPU), single downcast per layer.
            h = jnp.maximum(out, 0.0).astype(jnp.bfloat16)
        else:
            h = out

    out_ref[...] = h.astype(out_ref.dtype)


def _vmem_estimate_bytes(n, a, padded_dims):
    """Rough live-set estimate for the fused kernel (padded shapes)."""
    bf, f32 = 2, 4
    fmax = max(padded_dims)
    est = 0
    est += n * padded_dims[0] * bf                       # x
    est += n * a * (bf + f32 + 2 * bf)                   # adj bf16 + f32 copy + 2 prescaled copies
    est += sum(padded_dims[i] * padded_dims[i + 1] * bf  # weights
               for i in range(len(padded_dims) - 1))
    est += n * fmax * (f32 + bf) * 2                     # support / out / h
    est += a * fmax * (f32 + bf)                         # tmp
    est += n * padded_dims[-1] * f32                     # output block
    return est


def anchor_gcn_forward(x, node_anchor_adj, weights):
    """AnchorGCN.forward (eval mode): relu on every layer except the last."""
    n, nfeat = x.shape
    a = node_anchor_adj.shape[1]
    nclass = weights[-1].shape[1]
    num_layers = len(weights)

    # Pad every feature dim (nfeat, nhid..., nclass) to a multiple of 128 so all
    # activations are lane-dense; zero padding keeps the math exact.
    feat_dims = [nfeat] + [w.shape[1] for w in weights]
    padded_dims = [_round_up(d, LANES) for d in feat_dims]

    x_p = jnp.pad(x, ((0, 0), (0, padded_dims[0] - nfeat))).astype(jnp.bfloat16)
    adj_bf = node_anchor_adj.astype(jnp.bfloat16)

    padded_weights = []
    for li, w in enumerate(weights):
        fi, fo = w.shape
        w_p = jnp.pad(w, ((0, padded_dims[li] - fi),
                          (0, padded_dims[li + 1] - fo))).astype(jnp.bfloat16)
        padded_weights.append(w_p)

    # Explicit scoped-VMEM limit: raises the 16 MiB v5e default, capped at v7x's
    # 64 MiB physical VMEM so the same kernel compiles on all generations.
    est = _vmem_estimate_bytes(n, a, padded_dims)
    vmem_limit = int(min(64 << 20, max(32 << 20, 2 * est)))

    kernel = functools.partial(fused_anchor_gcn_kernel, num_layers=num_layers)

    out_padded = pl.pallas_call(
        kernel,
        out_shape=jax.ShapeDtypeStruct((n, padded_dims[-1]), jnp.float32),
        # Small, layer-invariant arrays: whole-array resident in VMEM, no grid.
        in_specs=[pl.BlockSpec(memory_space=pltpu.MemorySpace.VMEM)] * (2 + num_layers),
        out_specs=pl.BlockSpec(memory_space=pltpu.MemorySpace.VMEM),
        compiler_params=pltpu.CompilerParams(vmem_limit_bytes=vmem_limit),
    )(x_p, adj_bf, *padded_weights)

    return out_padded[:, :nclass]


# ----------------------------- references -----------------------------------

def reference_forward_f32(x, adj, weights):
    """Pure-JAX f32 reference mirroring the PyTorch module exactly (eval mode)."""
    def layer(h, w):
        support = h @ w
        node_norm = adj / jnp.maximum(jnp.sum(adj, axis=-2, keepdims=True), VERY_SMALL_NUMBER)
        anchor_norm = adj / jnp.maximum(jnp.sum(adj, axis=-1, keepdims=True), VERY_SMALL_NUMBER)
        return anchor_norm @ (node_norm.T @ support)

    for w in weights[:-1]:
        x = jax.nn.relu(layer(x, w))
    return layer(x, weights[-1])


def reference_forward_bf16_mirror(x, adj, weights):
    """Pure-JAX reference mirroring the kernel's bf16-operand / f32-accum math."""
    adj_bf = adj.astype(jnp.bfloat16)
    adj_f32 = adj_bf.astype(jnp.float32)
    inv_col = 1.0 / jnp.maximum(jnp.sum(adj_f32, axis=0, keepdims=True), VERY_SMALL_NUMBER)
    inv_row = 1.0 / jnp.maximum(jnp.sum(adj_f32, axis=1, keepdims=True), VERY_SMALL_NUMBER)
    adj_col_bf = (adj_f32 * inv_col).astype(jnp.bfloat16)
    adj_row_bf = (adj_f32 * inv_row).astype(jnp.bfloat16)

    h = x.astype(jnp.bfloat16)
    for li, w in enumerate(weights):
        w_bf = w.astype(jnp.bfloat16)
        support = jnp.dot(h, w_bf, preferred_element_type=jnp.float32)
        tmp = jnp.dot(adj_col_bf.T, support.astype(jnp.bfloat16),
                      preferred_element_type=jnp.float32)
        out = jnp.dot(adj_row_bf, tmp.astype(jnp.bfloat16),
                      preferred_element_type=jnp.float32)
        h = jnp.maximum(out, 0.0).astype(jnp.bfloat16) if li < len(weights) - 1 else out
    return h


def xavier_uniform(key, fan_in, fan_out):
    bound = (6.0 / (fan_in + fan_out)) ** 0.5
    return jax.random.uniform(
        key, (fan_in, fan_out), dtype=jnp.float32, minval=-bound, maxval=bound
    )


if __name__ == "__main__":
    # Small synthetic problem: N nodes, A anchors, nfeat -> nhid -> nclass (graph_hops=2).
    N, A = 32, 16
    nfeat, nhid, nclass = 16, 32, 8

    key = jax.random.PRNGKey(0)
    kx, kadj, kw0, kw1 = jax.random.split(key, 4)

    x = jax.random.normal(kx, (N, nfeat), dtype=jnp.float32)
    # Non-negative node->anchor adjacency (as produced by the IDGL anchor graph learner).
    node_anchor_adj = jax.nn.relu(jax.random.normal(kadj, (N, A), dtype=jnp.float32))

    # Deterministic xavier-uniform weights (fake_idx=None, bias=False, batch_norm=False).
    weights = [
        xavier_uniform(kw0, nfeat, nhid),
        xavier_uniform(kw1, nhid, nclass),
    ]

    fwd = jax.jit(anchor_gcn_forward)
    out = jax.block_until_ready(fwd(x, node_anchor_adj, weights))
    assert out.shape == (N, nclass)

    # Implementation check against a reference mirroring the kernel's bf16/f32 math.
    ref_mirror = reference_forward_bf16_mirror(x, node_anchor_adj, weights)
    assert jnp.allclose(out, ref_mirror, atol=2e-3, rtol=2e-3), \
        "mismatch vs bf16-mirrored reference"

    # Semantics check against the exact f32 PyTorch-equivalent forward
    # (looser tolerance: kernel feeds the MXU bf16 operands and folds the
    # normalization into bf16 pre-scaled adjacency copies).
    ref_f32 = reference_forward_f32(x, node_anchor_adj, weights)
    assert jnp.allclose(out, ref_f32, atol=3e-2, rtol=3e-2), \
        "mismatch vs f32 reference"

    print("KERNEL_OK")
</pallas_src>

<mosaic_0001>
module attributes {stable_mosaic.version = 11 : i64} {
  func.func @fused_anchor_gcn_kernel(%arg0: memref<32x128xbf16, #tpu.memory_space<vmem>>, %arg1: memref<32x16xbf16, #tpu.memory_space<vmem>>, %arg2: memref<128x128xbf16, #tpu.memory_space<vmem>>, %arg3: memref<128x128xbf16, #tpu.memory_space<vmem>>, %arg4: memref<32x128xf32, #tpu.memory_space<vmem>>) attributes {dimension_semantics = [], scalar_prefetch = 0 : i64, scratch_operands = 0 : i64, tpu.core_type = #tpu.core_type<tc>} {
    %c0 = arith.constant 0 : index
    %c0_0 = arith.constant 0 : index
    %0 = vector.load %arg1[%c0, %c0_0] : memref<32x16xbf16, #tpu.memory_space<vmem>>, vector<32x16xbf16>
    %1 = arith.extf %0 : vector<32x16xbf16> to vector<32x16xf32>
    %cst = arith.constant dense<0.000000e+00> : vector<16xf32>
    %2 = vector.multi_reduction <add>, %1, %cst [0] : vector<32x16xf32> to vector<16xf32>
    %3 = vector.shape_cast %2 : vector<16xf32> to vector<1x16xf32>
    %cst_1 = arith.constant dense<0.000000e+00> : vector<32xf32>
    %4 = vector.multi_reduction <add>, %1, %cst_1 [1] : vector<32x16xf32> to vector<32xf32>
    %5 = vector.shape_cast %4 : vector<32xf32> to vector<32x1xf32>
    %cst_2 = arith.constant 9.99999996E-13 : f32
    %6 = vector.broadcast %cst_2 : f32 to vector<1x16xf32>
    %7 = arith.maximumf %3, %6 : vector<1x16xf32>
    %cst_3 = arith.constant 1.000000e+00 : f32
    %8 = vector.broadcast %cst_3 : f32 to vector<1x16xf32>
    %9 = arith.divf %8, %7 : vector<1x16xf32>
    %cst_4 = arith.constant 9.99999996E-13 : f32
    %10 = vector.broadcast %cst_4 : f32 to vector<32x1xf32>
    %11 = arith.maximumf %5, %10 : vector<32x1xf32>
    %cst_5 = arith.constant 1.000000e+00 : f32
    %12 = vector.broadcast %cst_5 : f32 to vector<32x1xf32>
    %13 = arith.divf %12, %11 : vector<32x1xf32>
    %14 = vector.broadcast %9 : vector<1x16xf32> to vector<32x16xf32>
    %15 = arith.mulf %1, %14 : vector<32x16xf32>
    %16 = arith.truncf %15 : vector<32x16xf32> to vector<32x16xbf16>
    %17 = vector.broadcast %13 : vector<32x1xf32> to vector<32x16xf32>
    %18 = arith.mulf %1, %17 : vector<32x16xf32>
    %19 = arith.truncf %18 : vector<32x16xf32> to vector<32x16xbf16>
    %c0_6 = arith.constant 0 : index
    %c0_7 = arith.constant 0 : index
    %20 = vector.load %arg0[%c0_6, %c0_7] : memref<32x128xbf16, #tpu.memory_space<vmem>>, vector<32x128xbf16>
    %c0_8 = arith.constant 0 : index
    %c0_9 = arith.constant 0 : index
    %21 = vector.load %arg2[%c0_8, %c0_9] : memref<128x128xbf16, #tpu.memory_space<vmem>>, vector<128x128xbf16>
    %cst_10 = arith.constant dense<0.000000e+00> : vector<32x128xf32>
    %22 = tpu.matmul %20, %21, %cst_10 {dimension_numbers = #tpu.dot_dimension_numbers<[1], [0], [0], [1], [0, 0, 1, 1], [], []>} : vector<32x128xbf16>, vector<128x128xbf16>, vector<32x128xf32> -> vector<32x128xf32>
    %23 = arith.truncf %22 : vector<32x128xf32> to vector<32x128xbf16>
    %cst_11 = arith.constant dense<0.000000e+00> : vector<16x128xf32>
    %24 = tpu.matmul %16, %23, %cst_11 {dimension_numbers = #tpu.dot_dimension_numbers<[0], [0], [1], [1], [0, 1, 1, 1], [], []>} : vector<32x16xbf16>, vector<32x128xbf16>, vector<16x128xf32> -> vector<16x128xf32>
    %25 = arith.truncf %24 : vector<16x128xf32> to vector<16x128xbf16>
    %cst_12 = arith.constant dense<0.000000e+00> : vector<32x128xf32>
    %26 = tpu.matmul %19, %25, %cst_12 {dimension_numbers = #tpu.dot_dimension_numbers<[1], [0], [0], [1], [0, 0, 1, 1], [], []>} : vector<32x16xbf16>, vector<16x128xbf16>, vector<32x128xf32> -> vector<32x128xf32>
    %cst_13 = arith.constant 0.000000e+00 : f32
    %27 = vector.broadcast %cst_13 : f32 to vector<32x128xf32>
    %28 = arith.maximumf %26, %27 : vector<32x128xf32>
    %29 = arith.truncf %28 : vector<32x128xf32> to vector<32x128xbf16>
    %c0_14 = arith.constant 0 : index
    %c0_15 = arith.constant 0 : index
    %30 = vector.load %arg3[%c0_14, %c0_15] : memref<128x128xbf16, #tpu.memory_space<vmem>>, vector<128x128xbf16>
    %cst_16 = arith.constant dense<0.000000e+00> : vector<32x128xf32>
    %31 = tpu.matmul %29, %30, %cst_16 {dimension_numbers = #tpu.dot_dimension_numbers<[1], [0], [0], [1], [0, 0, 1, 1], [], []>} : vector<32x128xbf16>, vector<128x128xbf16>, vector<32x128xf32> -> vector<32x128xf32>
    %32 = arith.truncf %31 : vector<32x128xf32> to vector<32x128xbf16>
    %cst_17 = arith.constant dense<0.000000e+00> : vector<16x128xf32>
    %33 = tpu.matmul %16, %32, %cst_17 {dimension_numbers = #tpu.dot_dimension_numbers<[0], [0], [1], [1], [0, 1, 1, 1], [], []>} : vector<32x16xbf16>, vector<32x128xbf16>, vector<16x128xf32> -> vector<16x128xf32>
    %34 = arith.truncf %33 : vector<16x128xf32> to vector<16x128xbf16>
    %cst_18 = arith.constant dense<0.000000e+00> : vector<32x128xf32>
    %35 = tpu.matmul %19, %34, %cst_18 {dimension_numbers = #tpu.dot_dimension_numbers<[1], [0], [0], [1], [0, 0, 1, 1], [], []>} : vector<32x16xbf16>, vector<16x128xbf16>, vector<32x128xf32> -> vector<32x128xf32>
    %c0_19 = arith.constant 0 : index
    %c0_20 = arith.constant 0 : index
    %36 = vector.load %arg4[%c0_19, %c0_20] : memref<32x128xf32, #tpu.memory_space<vmem>>, vector<32x128xf32>
    tpu.vector_store %arg4[%c0_19, %c0_20], %35 {strides = array<i32>} : memref<32x128xf32, #tpu.memory_space<vmem>>, vector<32x128xf32>,
    return
  }
}

</mosaic_0001>

<bundles_post_ra>
// kernel: anchor_gcn_forward.1
= control target key start
LH: loop header
LB: loop body
LE: loop exit
PB: predicated region body
PF: predicated region fallthrough
CT: control target
= control target key end

     0   :  { %vm26_vm0 = vcmask 130048   ;;  %v707_v37 = vmov 0.0   ;;  %vm708_vm1 = vmmov 0   ;;  %vm222_vm2 = vcmask 261120   ;;  %s850_s2 = inlined_call_operand.vmem [shape: bf16[128,128], index: 2, kind: input, shape index: {}]   ;;  %s851_s0 = inlined_call_operand.vmem [shape: bf16[32,128], index: 0, kind: input, shape index: {}]   ;;  %s852_s1 = inlined_call_operand.vmem [shape: bf16[32,16], index: 1, kind: input, shape index: {}]   ;;  %s853_s3 = inlined_call_operand.vmem [shape: bf16[128,128], index: 3, kind: input, shape index: {}]   ;;  %s854_s4 = inlined_call_operand.vmem [shape: f32[32,128], index: 4, kind: output, shape index: {}]  }
   0x1   :  { %v679_v0 = vld [vmem:[%s850_s2] sm:$0xff]   ;;  %v680_v1 = vld [vmem:[%s850_s2 + $0x8] sm:$0xff]   ;;  %v681_v2 = vld [vmem:[%s850_s2 + $0x10] sm:$0xff]   ;;  %628 = vmatprep.subr.bf16.mxu1 %v707_v37  ;;  %632 = vmatprep.mubr.msk.bf16.mxu1 %vm708_vm1, %v707_v37 }
   0x2   :  { %608 = vmatprep.subr.bf16.mxu0 %v679_v0  ;;  %v682_v3 = vld [vmem:[%s850_s2 + $0x18] sm:$0xff]   ;;  %v687_v4 = vld [vmem:[%s851_s0] sm:$0xff]   ;;  %v575_v6 = vld [vmem:[%s852_s1 + $0x8] sm:$0xff]  }
   0x3   :  { %609 = vmatpush3.bf16.msra.mxu0 %v679_v0  ;;  %624 = vmatprep.mubr.bf16.mxu0 %v687_v4  ;;  %v568_v5 = vld [vmem:[%s852_s1] sm:$0xff]   ;;  %v759_v9 = vunpack.c.l.bf16 %v575_v6  ;;  %v761_v10 = vunpack.c.h.bf16 %v575_v6  ;;  %v684_v17 = vld [vmem:[%s850_s2 + $0x28] sm:$0xff]   ;;  %v685_v20 = vld [vmem:[%s850_s2 + $0x30] sm:$0xff]  }
   0x4   :  { %610 = vmatprep.subr.bf16.mxu0 %v680_v1  ;;  %v755_v7 = vunpack.c.l.bf16 %v568_v5  ;;  %v757_v8 = vunpack.c.h.bf16 %v568_v5  ;;  %v683_v11 = vld [vmem:[%s850_s2 + $0x20] sm:$0xff]   ;;  %v686_v23 = vld [vmem:[%s850_s2 + $0x38] sm:$0xff]   ;;  %v688_v27 = vld [vmem:[%s851_s0 + $0x8] sm:$0xff]  }
   0x5   :  { %v30_v14 = vsel %vm26_vm0, %v759_v9, 0.0  ;;  %v32_v16 = vsel %vm26_vm0, %v761_v10, 0.0  ;;  %v690_v5 = vld [vmem:[%s853_s3 + $0x8] sm:$0xff]   ;;  %v691_v6 = vld [vmem:[%s853_s3 + $0x10] sm:$0xff]  }
   0x6   :  { %v27_v12 = vsel %vm26_vm0, %v755_v7, 0.0  ;;  %v28_v13 = vsel %vm26_vm0, %v757_v8, 0.0 }
   0x7   :  { %611 = vmatpush3.bf16.msra.mxu0 %v680_v1  ;;  %v29_v15 = vadd.f32 %v28_v13, %v27_v12  ;;  %40 = vadd.xlane.f32.xlu1 %v27_v12 }
   0x8   :  { %612 = vmatprep.subr.bf16.mxu0 %v681_v2 }
   0x9   :  { %v31_v18 = vadd.f32 %v30_v14, %v29_v15 }
   0xb   :  { %613 = vmatpush3.bf16.msra.mxu0 %v681_v2  ;;  %v33_v19 = vadd.f32 %v32_v16, %v31_v18  ;;  %42 = vadd.xlane.f32.xlu1 %v28_v13 }
   0xc   :  { %614 = vmatprep.subr.bf16.mxu0 %v682_v3 }
   0xd   :  { %v34_v21 = vrot.slane %v33_v19, 4 }
   0xf   :  { %615 = vmatpush3.bf16.msra.mxu0 %v682_v3  ;;  %v35_v22 = vadd.f32 %v34_v21, %v33_v19  ;;  %46 = vadd.xlane.f32.xlu1 %v32_v16  ;;  %v689_v3 = vld [vmem:[%s853_s3] sm:$0xff]  }
  0x10   :  { %616 = vmatprep.subr.bf16.mxu0 %v683_v11 }
  0x11   :  { %v36_v24 = vrot.slane %v35_v22, 2 }
  0x13   :  { %617 = vmatpush3.bf16.msra.mxu0 %v683_v11  ;;  %v37_v25 = vadd.f32 %v36_v24, %v35_v22  ;;  %v696_v11 = vld [vmem:[%s853_s3 + $0x38] sm:$0xff]  }
  0x14   :  { %618 = vmatprep.subr.bf16.mxu0 %v684_v17 }
  0x15   :  { %v38_v26 = vrot.slane %v37_v25, 1 }
  0x17   :  { %619 = vmatpush3.bf16.msra.mxu0 %v684_v17  ;;  %v39_v28 = vadd.f32 %v38_v26, %v37_v25 }
  0x18   :  { %620 = vmatprep.subr.bf16.mxu0 %v685_v20 }
  0x19   :  { %v48_v29 = vmax.f32 %v39_v28, 1e-12 }
  0x1b   :  { %621 = vmatpush3.bf16.msra.mxu0 %v685_v20  ;;  %697 = vrcp.f32 %v48_v29 }
  0x1c   :  { %622 = vmatprep.subr.bf16.mxu0 %v686_v23 }
  0x1f   :  { %623 = vmatpush3.bf16.msra.mxu0 %v686_v23 }
  0x20   :  { %662 = vmatprep.subr.bf16.mxu0 %v707_v37 }
  0x22   :  { %625 = vmatmul.mubr.bf16.vlgmr.msra.gmra.mrb[0].mxu0 %v688_v27 }
  0x23   :  { %666 = vmatprep.mubr.msk.bf16.mxu0 %vm708_vm1, %v707_v37 }
  0x25   :  { %v698_v30 = vpop.eup %697 }
  0x26   :  { %v63_v31 = vmul.f32 %v698_v30, %v755_v7  ;;  %v64_v32 = vmul.f32 %v698_v30, %v757_v8  ;;  %v65_v33 = vmul.f32 %v698_v30, %v759_v9  ;;  %v66_v34 = vmul.f32 %v698_v30, %v761_v10 }
  0x28   :  { %v67_v35 = vpack.c.bf16 %v64_v32, %v63_v31  ;;  %v68_v36 = vpack.c.bf16 %v66_v34, %v65_v33 }
  0x2a   :  { %206 = vxpose.xlu0.c.b16.start [1/2] (short) (narrow) %v67_v35, 16 }
  0x2e   :  { %207 = vxpose.xlu0.c.b16.end [2/2] (short) (narrow) %v68_v36, 16 }
  0x3b   :  { %44 = vadd.xlane.f32.xlu0 %v30_v14 }
  0x90   :  { %v795_v44 = vpop.trf.xlu0 }
  0x94   :  { %v41_v45 = vpop.xlane.xlu1 %40 }
  0x95   :  { %v51_v47 = vmax.f32 %v41_v45, 1e-12 }
  0x97   :  { %699 = vrcp.f32 %v51_v47 }
  0x98   :  { %v43_v46 = vpop.xlane.xlu1 %42 }
  0x99   :  { %v52_v48 = vmax.f32 %v43_v46, 1e-12 }
  0x9b   :  { %701 = vrcp.f32 %v52_v48 }
  0x9c   :  { %v47_v54 = vpop.xlane.xlu1 %46 }
  0x9d   :  { %v54_v56 = vmax.f32 %v47_v54, 1e-12 }
  0x9f   :  { %703 = vrcp.f32 %v54_v56 }
  0xa1   :  { %v700_v49 = vpop.eup %699 }
  0xa2   :  { %v69_v51 = vmul.f32 %v700_v49, %v755_v7  ;;  %v692_v7 = vld [vmem:[%s853_s3 + $0x18] sm:$0xff]  }
  0xa5   :  { %v702_v50 = vpop.eup %701 }
  0xa6   :  { %v70_v52 = vmul.f32 %v702_v50, %v757_v8  ;;  %v693_v8 = vld [vmem:[%s853_s3 + $0x20] sm:$0xff]  }
  0xa8   :  { %v801_v53 = vpack.c.bf16 %v70_v52, %v69_v51 }
  0xa9   :  { %v704_v58 = vpop.eup %703 }
  0xaa   :  { %v72_v61 = vmul.f32 %v704_v58, %v761_v10  ;;  %v695_v10 = vld [vmem:[%s853_s3 + $0x30] sm:$0xff]  }
  0xc8   :  { %v45_v55 = vpop.xlane.xlu0 %44 }
  0xc9   :  { %v53_v57 = vmax.f32 %v45_v55, 1e-12 }
  0xcb   :  { %705 = vrcp.f32 %v53_v57 }
  0xd5   :  { %v706_v59 = vpop.eup %705 }
  0xd6   :  { %v71_v62 = vmul.f32 %v706_v59, %v759_v9  ;;  %v694_v9 = vld [vmem:[%s853_s3 + $0x28] sm:$0xff]  }
  0xd8   :  { %v74_v4 = vpack.c.bf16 %v72_v61, %v71_v62 }
  0xf5   :  { %v626_v38 = vpop.f32.mrb[0].mxu0 }
  0xf6   :  { %v189_v39 = vpop.f32.mrb[1].mxu0 }
  0xf7   :  { %v627_v40 = vpop.f32.mrb[2].mxu0 }
  0xf8   :  { %v205_v41 = vpack.c.bf16 %v627_v40, %v626_v38  ;;  %v192_v42 = vpop.f32.mrb[3].mxu0 }
  0xf9   :  { %v204_v43 = vpack.c.bf16 %v192_v42, %v189_v39 }
  0xfb   :  { %629 = vmatpush3.bf16.msra.mxu1 %v204_v43 }
  0xfc   :  { %630 = vmatprep.subr.bf16.mxu1 %v707_v37 }
  0xff   :  { %631 = vmatpush3.bf16.msra.mxu1 %v205_v41 }
 0x102   :  { %633 = vmatmul.mubr.msk.bf16.vlgmr.msra.gmra.mrb[0].mxu1 %vm222_vm2, %v795_v44 }
 0x103   :  { %638 = vmatprep.mubr.msk.bf16.mxu1 %vm26_vm0, %v801_v53 }
 0x1d5   :  { %v260_v60 = vpop.f32.mrb[0].mxu1 }
 0x1d6   :  { %v634_v63 = vpop.f32.mrb[1].mxu1 }
 0x1d7   :  { %v263_v0 = vpop.f32.mrb[2].mxu1 }
 0x1d8   :  { %v267_v1 = vpack.c.bf16 %v263_v0, %v260_v60  ;;  %v635_v2 = vpop.f32.mrb[3].mxu1 }
 0x1da   :  { %636 = vmatprep.subr.bf16.mxu1 %v267_v1 }
 0x1db   :  { %637 = vmatpush3.bf16.msra.mxu1 %v267_v1 }
 0x1dc   :  { %642 = vmatprep.subr.bf16.mxu1 %v689_v3 }
 0x1de   :  { %639 = vmatmul.mubr.msk.bf16.vlgmr.msra.gmra.mrb[4].mxu1 %vm26_vm0, %v74_v4 }
 0x1df   :  { %643 = vmatpush3.bf16.msra.mxu1 %v689_v3 }
 0x1e0   :  { %644 = vmatprep.subr.bf16.mxu1 %v690_v5 }
 0x1e3   :  { %645 = vmatpush3.bf16.msra.mxu1 %v690_v5 }
 0x1e4   :  { %646 = vmatprep.subr.bf16.mxu1 %v691_v6 }
 0x1e7   :  { %647 = vmatpush3.bf16.msra.mxu1 %v691_v6 }
 0x1e8   :  { %648 = vmatprep.subr.bf16.mxu1 %v692_v7 }
 0x1eb   :  { %649 = vmatpush3.bf16.msra.mxu1 %v692_v7 }
 0x1ec   :  { %650 = vmatprep.subr.bf16.mxu1 %v693_v8 }
 0x1ef   :  { %651 = vmatpush3.bf16.msra.mxu1 %v693_v8 }
 0x1f0   :  { %652 = vmatprep.subr.bf16.mxu1 %v694_v9 }
 0x1f3   :  { %653 = vmatpush3.bf16.msra.mxu1 %v694_v9 }
 0x1f4   :  { %654 = vmatprep.subr.bf16.mxu1 %v695_v10 }
 0x1f7   :  { %655 = vmatpush3.bf16.msra.mxu1 %v695_v10 }
 0x1f8   :  { %656 = vmatprep.subr.bf16.mxu1 %v696_v11 }
 0x1fb   :  { %657 = vmatpush3.bf16.msra.mxu1 %v696_v11 }
 0x2b1   :  { %v640_v12 = vpop.f32.mrb[4].mxu1 }
 0x2b2   :  { %v308_v13 = vpop.f32.mrb[5].mxu1  ;;  %v325_v15 = vmax.f32 %v640_v12, 0.0 }
 0x2b3   :  { %v641_v14 = vpop.f32.mrb[6].mxu1  ;;  %v323_v18 = vmax.f32 %v308_v13, 0.0 }
 0x2b4   :  { %v326_v16 = vmax.f32 %v641_v14, 0.0  ;;  %v311_v17 = vpop.f32.mrb[7].mxu1 }
 0x2b5   :  { %v324_v19 = vmax.f32 %v311_v17, 0.0 }
 0x2b6   :  { %v328_v20 = vpack.c.bf16 %v326_v16, %v325_v15 }
 0x2b7   :  { %v327_v21 = vpack.c.bf16 %v324_v19, %v323_v18 }
 0x2b9   :  { %658 = vmatprep.mubr.bf16.mxu1 %v327_v21 }
 0x2ba   :  { %659 = vmatmul.mubr.bf16.vlgmr.msra.gmra.mrb[8].mxu1 %v328_v20 }
 0x38d   :  { %v660_v22 = vpop.f32.mrb[8].mxu1 }
 0x38e   :  { %v427_v23 = vpop.f32.mrb[9].mxu1 }
 0x38f   :  { %v661_v24 = vpop.f32.mrb[10].mxu1 }
 0x390   :  { %v443_v25 = vpack.c.bf16 %v661_v24, %v660_v22  ;;  %v430_v26 = vpop.f32.mrb[11].mxu1 }
 0x391   :  { %v442_v27 = vpack.c.bf16 %v430_v26, %v427_v23 }
 0x393   :  { %663 = vmatpush3.bf16.msra.mxu0 %v442_v27 }
 0x394   :  { %664 = vmatprep.subr.bf16.mxu0 %v707_v37 }
 0x397   :  { %665 = vmatpush3.bf16.msra.mxu0 %v443_v25 }
 0x39a   :  { %667 = vmatmul.mubr.msk.bf16.vlgmr.msra.gmra.mrb[4].mxu0 %vm222_vm2, %v795_v44 }
 0x39b   :  { %672 = vmatprep.mubr.msk.bf16.mxu0 %vm26_vm0, %v801_v53 }
 0x46d   :  { %v478_v28 = vpop.f32.mrb[4].mxu0 }
 0x46e   :  { %v668_v29 = vpop.f32.mrb[5].mxu0 }
 0x46f   :  { %v481_v30 = vpop.f32.mrb[6].mxu0 }
 0x470   :  { %v485_v31 = vpack.c.bf16 %v481_v30, %v478_v28  ;;  %v669_v32 = vpop.f32.mrb[7].mxu0 }
 0x472   :  { %670 = vmatprep.subr.bf16.mxu0 %v485_v31 }
 0x473   :  { %671 = vmatpush3.bf16.msra.mxu0 %v485_v31 }
 0x476   :  { %673 = vmatmul.mubr.msk.bf16.vlgmr.msra.gmra.mrb[8].mxu0 %vm26_vm0, %v74_v4 }
 0x549   :  { %v674_v33 = vpop.f32.mrb[8].mxu0 }
 0x54a   :  { %537 = vst [vmem:[%s854_s4 + $0x10] sm:$0xff] %v674_v33  ;;  %v520_v34 = vpop.f32.mrb[9].mxu0 }
 0x54b   :  { %535 = vst [vmem:[%s854_s4] sm:$0xff] %v520_v34  ;;  %v675_v35 = vpop.f32.mrb[10].mxu0 }
 0x54c   :  { %538 = vst [vmem:[%s854_s4 + $0x18] sm:$0xff] %v675_v35  ;;  %v523_v36 = vpop.f32.mrb[11].mxu0 }
 0x54d   :  { %536 = vst [vmem:[%s854_s4 + $0x8] sm:$0xff] %v523_v36 }

</bundles_post_ra>
